<compile_context>
chip_gen: v6e
topology: v6e:2x2x1
jax: 0.10.0
libtpu: 0.0.40
codegen_flags: <defaults>
</compile_context>

<pallas_src>
import jax
import jax.numpy as jnp
from jax.experimental import pallas as pl
from jax.experimental.pallas import tpu as pltpu


def _identity_kernel(x_ref, o_ref):
    # Pure pass-through: the base-class forward defines no compute.
    o_ref[...] = x_ref[...]


# Tensors smaller than this skip the kernel entirely: custom-call dispatch plus
# per-step pipeline overhead (~us scale) dwarfs moving a few KiB.
_KERNEL_MIN_BYTES = 256 * 1024


def _lane_dense_view(x: jax.Array):
    """Copy-free, padding-free reshape to a lane-dense 2-D view.

    Collapses trailing axes until the column count reaches >= 128 (ideally a
    multiple of 128), e.g. (2, 4, 16, 16) -> (8, 256), so the output tile is
    lane-dense and stores are unmasked.  Falls back to a fully-flattened
    (n // 128, 128) view when that keeps the lane axis dense.
    """
    n = int(x.size)
    dims = [int(d) for d in x.shape] if x.ndim > 0 else [1]
    cols = 1
    while dims and cols < 128:
        cols *= dims.pop()
    rows = max(1, n // max(1, cols))
    if cols % 128 != 0 and n % 128 == 0:
        cols, rows = 128, n // 128
    return x.reshape(rows, cols), x.shape


def _block_budget():
    """(target_block_bytes, vmem_limit_bytes) sized per TPU generation."""
    kind = ""
    try:
        kind = jax.devices()[0].device_kind.lower()
    except Exception:
        pass
    if "v5" in kind:
        # v5e scoped-VMEM default is 16 MiB: 3 MiB blocks x (in+out) x 2
        # double-buffers = 12 MiB resident; scope 24 MiB for headroom.
        return 3 * 1024 * 1024, 24 * 1024 * 1024
    # v6e / v7x (and default): 8 MiB blocks amortize the ~0.35 us per-step
    # overhead against fast HBM; 8 MiB x (in+out) x 2 buffers = 32 MiB
    # resident, so scope 48 MiB (under v7x's 64 MiB physical, trivial on v6e).
    return 8 * 1024 * 1024, 48 * 1024 * 1024


def _pallas_identity(x: jax.Array, *, force_kernel: bool = False) -> jax.Array:
    """Identity through a Pallas kernel (large tensors) or a no-op (small)."""
    nbytes = int(x.size) * x.dtype.itemsize
    if x.size == 0 or (not force_kernel and nbytes < _KERNEL_MIN_BYTES):
        # Identity semantics are unchanged; 0 bytes of HBM traffic beats a
        # full read+write through the kernel for sub-tile tensors.
        return x

    x2d, orig_shape = _lane_dense_view(x)
    rows, cols = x2d.shape
    itemsize = x2d.dtype.itemsize
    # Sublane multiple for this dtype: 8 for 32-bit, 16 for bf16, 32 for int8.
    sub = 8 * max(1, 4 // itemsize)

    target_block_bytes, vmem_limit = _block_budget()
    row_bytes = cols * itemsize
    rows_for_target = max(1, target_block_bytes // row_bytes)

    if rows_for_target >= rows:
        grid_n = 1
        # Large tensors that fit in one block still get >= 2 grid steps so
        # dimension_semantics=("parallel",) can shard DMA across v7x's 2 TCs.
        if nbytes >= 2 * _KERNEL_MIN_BYTES and rows >= 2 * sub:
            grid_n = 2
    else:
        grid_n = pl.cdiv(rows, rows_for_target)

    if grid_n == 1:
        block_rows = rows  # single block covering the full array (always legal)
    else:
        # Balance tiles: pick the grid first, then round the per-step row count
        # up to the sublane multiple, avoiding a tiny ragged final tile.
        block_rows = ((pl.cdiv(rows, grid_n) + sub - 1) // sub) * sub
        block_rows = min(block_rows, rows)
        grid_n = pl.cdiv(rows, block_rows)

    out2d = pl.pallas_call(
        _identity_kernel,
        out_shape=jax.ShapeDtypeStruct((rows, cols), x2d.dtype),
        grid_spec=pltpu.PrefetchScalarGridSpec(
            num_scalar_prefetch=0,
            grid=(grid_n,),
            in_specs=[pl.BlockSpec((block_rows, cols), lambda i: (i, 0))],
            out_specs=pl.BlockSpec((block_rows, cols), lambda i: (i, 0)),
        ),
        # No input_output_aliases: eager-mode aliasing of a live input forces a
        # defensive copy (neutral at best), and donation would invalidate the
        # caller's buffer.
        # TODO(synk): wrap in jax.jit with donate_argnums if true in-place
        # aliasing is ever required by a concrete subclass.
        compiler_params=pltpu.CompilerParams(
            dimension_semantics=("parallel",),
            vmem_limit_bytes=vmem_limit,
        ),
    )(x2d)

    return out2d.reshape(orig_shape)


class BaseModelForFinetune:
    """JAX/Pallas mirror of the abstract PyTorch BaseModelForFinetune."""

    def __init__(self, **kwargs):
        # Base class creates no parameters.
        pass

    def forward(self, batch_input):
        # The PyTorch base-class forward body is `pass`: no parameters, no
        # compute, returns None.  The fastest faithful lowering is to move no
        # bytes at all, so no kernel is launched here.
        # TODO(synk): concrete subclasses implement the real forward compute.
        return None

    def free_top_n_layers(self, module, n):
        raise NotImplementedError

    def compute_loss(self, logit, label_id):
        raise NotImplementedError


if __name__ == "__main__":
    key = jax.random.PRNGKey(0)
    k1, k2 = jax.random.split(key)
    # Small batch consistent with a typical finetune input dict.
    batch_input = {
        "x": jax.random.normal(k1, (2, 4, 16, 16), dtype=jnp.float32),
        "mask": jax.random.normal(k2, (2, 8), dtype=jnp.float32),
    }

    # Default path: sub-tile tensors bypass the kernel (identity, zero traffic).
    touched = jax.tree_util.tree_map(_pallas_identity, batch_input)
    # Demonstration: run the Pallas identity kernel once on the main tensor
    # via the lane-dense (8, 256) view.
    forced = _pallas_identity(batch_input["x"], force_kernel=True)

    touched, forced = jax.block_until_ready((touched, forced))

    for name, ref in batch_input.items():
        assert jnp.array_equal(touched[name], ref), name
    assert jnp.array_equal(forced, batch_input["x"])

    model = BaseModelForFinetune()
    out = model.forward(batch_input)
    assert out is None  # matches PyTorch `pass` forward semantics

    print("KERNEL_OK")
</pallas_src>

<mosaic_0001>
module attributes {stable_mosaic.version = 11 : i64} {
  func.func @_identity_kernel(%arg0: i32, %arg1: memref<8x256xf32, #tpu.memory_space<vmem>>, %arg2: memref<8x256xf32, #tpu.memory_space<vmem>>) attributes {dimension_semantics = [#tpu.dimension_semantics<parallel>], iteration_bounds = array<i64: 1>, scalar_prefetch = 0 : i64, scratch_operands = 0 : i64, tpu.core_type = #tpu.core_type<tc>, window_params = [{transform_indices = @transform_0, window_bounds = array<i64: 8, 256>}, {transform_indices = @transform_1, window_bounds = array<i64: 8, 256>}]} {
    %c0 = arith.constant 0 : index
    %c0_0 = arith.constant 0 : index
    %0 = vector.load %arg1[%c0, %c0_0] : memref<8x256xf32, #tpu.memory_space<vmem>>, vector<8x256xf32>
    %c0_1 = arith.constant 0 : index
    %c0_2 = arith.constant 0 : index
    %1 = vector.load %arg2[%c0_1, %c0_2] : memref<8x256xf32, #tpu.memory_space<vmem>>, vector<8x256xf32>
    tpu.vector_store %arg2[%c0_1, %c0_2], %0 {strides = array<i32>} : memref<8x256xf32, #tpu.memory_space<vmem>>, vector<8x256xf32>,
    return
  }
  func.func @transform_0(%arg0: i32) -> (i32, i32) {
    %c0_i32 = arith.constant 0 : i32
    %c0_i32_0 = arith.constant 0 : i32
    return %arg0, %c0_i32 : i32, i32
  }
  func.func @transform_1(%arg0: i32) -> (i32, i32) {
    %c0_i32 = arith.constant 0 : i32
    %c0_i32_0 = arith.constant 0 : i32
    return %arg0, %c0_i32 : i32, i32
  }
}

</mosaic_0001>

<bundles_post_ra>
// kernel: tpu_custom_call.1
= control target key start
LH: loop header
LB: loop body
LE: loop exit
PB: predicated region body
PF: predicated region fallthrough
CT: control target
= control target key end

     0   :  { %6 = vsyncpa [#allocation3], 0  ;;  %s104_s0 = inlined_call_operand.hbm [shape: f32[8,256], index: 0, kind: input, shape index: {}]   ;;  %s105_s1 = inlined_call_operand.hbm [shape: f32[8,256], index: 1, kind: output, shape index: {}]  }
   0x1   :  { %7 = vsyncpa [#allocation4], 0  ;;  %s86_s6 = smov [#allocation2]  }
   0x2   :  { %s14_s7 = sshll.u32 %s86_s6, 4  ;;  %s15_s7 = int_to_ptr.vmem [resolvable:$true] %s14_s7 }
   0x3   :  { %s50_s8 = scalar_lea.vmem %s15_s7, 256  ;;  %p55_p1 = scmp.lt.s32.totalorder %s15_s7, %s15_s7 }
   0x4   :  { %p51_p0 = scmp.ne.s32.totalorder %s15_s7, %s50_s8  ;;  %p56_p2 = scmp.lt.s32.totalorder %s50_s8, %s50_s8 }
   0x6   :  { %p57_p3 = por %p56_p2, %p55_p1 }
   0x8   :  { %p58_p4 = pnand %p57_p3, %p51_p0 }
   0xa   :  { %61 = shalt.err (!%p58_p4)
}
   0xb   :  { %17 = dma.hbm_to_vmem [thread:$0]  %s104_s0, 256, %s15_s7, [#allocation3]  }
   0xc   :  { %82 = dma.done.wait [#allocation3], 256  }
   0xd   :  { %83 = vsyncadd [#allocation3], 4294967040  ;;  %s87_s11 = smov [#allocation5]   ;;  %v21_v0 = vld [vmem:[#allocation2] sm:$0xff]  ;;  %v22_v1 = vld [vmem:[#allocation2 + $0x8] sm:$0xff] }
   0xe   :  { %s31_s12 = sshll.u32 %s87_s11, 4  ;;  %23 = vst [vmem:[#allocation5] sm:$0xff] %v21_v0  ;;  %24 = vst [vmem:[#allocation5 + $0x8] sm:$0xff] %v22_v1  ;;  %s32_s12 = int_to_ptr.vmem [resolvable:$true] %s31_s12 }
   0xf   :  { %s62_s13 = scalar_lea.vmem %s32_s12, 256  ;;  %p67_p6 = scmp.lt.s32.totalorder %s32_s12, %s32_s12 }
  0x10   :  { %p63_p5 = scmp.ne.s32.totalorder %s32_s12, %s62_s13  ;;  %p68_p7 = scmp.lt.s32.totalorder %s62_s13, %s62_s13 }
  0x12   :  { %p69_p8 = por %p68_p7, %p67_p6 }
  0x14   :  { %p70_p9 = pnand %p69_p8, %p63_p5 }
  0x16   :  { %73 = shalt.err (!%p70_p9)
}
  0x17   :  { %34 = dma.vmem_to_hbm [thread:$0]  %s32_s12, 256, %s105_s1, [#allocation4]  }
  0x18   :  { %84 = dma.done.wait [#allocation4], 256  }
  0x19   :  { %85 = vsyncadd [#allocation4], 4294967040 }
  0x1a   :  { %38 = vsyncpa [#allocation3], 1 }
  0x1b   :  { %39 = vsyncpa [#allocation4], 1 }

</bundles_post_ra>
